<compile_context>
chip_gen: v6e
topology: v6e:2x2x1
jax: 0.10.0
libtpu: 0.0.40
codegen_flags: <defaults>
</compile_context>

<pallas_src>
import functools

import jax
import jax.numpy as jnp
from jax.experimental import pallas as pl
from jax.experimental.pallas import tpu as pltpu


def _round_up(x, m):
    return ((x + m - 1) // m) * m


def _device_kind():
    try:
        return jax.devices()[0].device_kind.lower()
    except Exception:
        return ""


def _default_elementwise_dtype():
    # bf16 VALU exists on v6e / v7x; v5e (and older) lack it -> keep f32 elementwise.
    k = _device_kind()
    if "v6" in k or "v7" in k:
        return jnp.bfloat16
    return jnp.float32


def _num_tensorcores():
    # v7x has 2 TensorCores per chip; v5e/v6e have 1.
    return 2 if "v7" in _device_kind() else 1


def mlp_kernel(x_ref, w1_ref, w2_ref, w3_ref, w4_ref, b_ref, o_ref, *, elem_dtype):
    """One batch tile of the fused MLP.

    x_ref : (TB, IN)   f32  (cast to bf16 in-kernel)
    w*_ref: [in, out]  bf16 (VMEM-resident across grid steps)
    b_ref : (4, 256)   f32, row i = bias of layer i+1, zero-padded
    o_ref : (TB, OUT)  f32, true (unpadded) output width
    """
    h1 = w1_ref.shape[1]
    h2 = w2_ref.shape[1]
    h3 = w3_ref.shape[1]
    out_f = w4_ref.shape[1]
    cdt = w1_ref.dtype  # bf16 MXU input dtype

    # Fused input cast (rides VPU slack instead of a separate XLA pass).
    x = x_ref[...].astype(cdt)

    # Layers 1-3: matmul (accum in elem_dtype: f32 on v5e, bf16 on v6e/v7x),
    # bias add + ReLU in the same dtype.
    h = jnp.dot(x, w1_ref[...], preferred_element_type=elem_dtype)
    h = jnp.maximum(h + b_ref[0:1, :h1].astype(elem_dtype), 0.0)

    h = jnp.dot(h.astype(cdt), w2_ref[...], preferred_element_type=elem_dtype)
    h = jnp.maximum(h + b_ref[1:2, :h2].astype(elem_dtype), 0.0)

    h = jnp.dot(h.astype(cdt), w3_ref[...], preferred_element_type=elem_dtype)
    h = jnp.maximum(h + b_ref[2:3, :h3].astype(elem_dtype), 0.0)

    # Final layer (no ReLU): always f32 accumulation + f32 bias add.
    h = jnp.dot(h.astype(cdt), w4_ref[...], preferred_element_type=jnp.float32)
    h = h + b_ref[3:4, :out_f]

    o_ref[...] = h.astype(o_ref.dtype)


def init_params(key, in_features, hidden_features, out_features, dtype=jnp.float32):
    """nn.Linear-style init U(-1/sqrt(fan_in), 1/sqrt(fan_in)); weights stored [in, out]."""
    dims = [in_features,
            hidden_features * 8,
            hidden_features * 4,
            hidden_features * 2,
            out_features]
    params = {}
    keys = jax.random.split(key, 8)
    for i in range(4):
        fan_in, fan_out = dims[i], dims[i + 1]
        bound = 1.0 / float(fan_in) ** 0.5
        params[f"w{i + 1}"] = jax.random.uniform(
            keys[2 * i], (fan_in, fan_out), dtype=dtype, minval=-bound, maxval=bound)
        params[f"b{i + 1}"] = jax.random.uniform(
            keys[2 * i + 1], (fan_out,), dtype=dtype, minval=-bound, maxval=bound)
    return params


def prepare_kernel_params(params, compute_dtype=jnp.bfloat16):
    """Cast weights to bf16 [in,out] layout; pack the four biases into one f32 array."""
    w1 = params["w1"].astype(compute_dtype)
    w2 = params["w2"].astype(compute_dtype)
    w3 = params["w3"].astype(compute_dtype)
    w4 = params["w4"].astype(compute_dtype)   # (64, out_features) -- no lane padding needed

    widths = (w1.shape[1], w2.shape[1], w3.shape[1], w4.shape[1])
    bw = max(widths)
    b = jnp.zeros((4, bw), jnp.float32)
    b = b.at[0, :widths[0]].set(params["b1"].astype(jnp.float32))
    b = b.at[1, :widths[1]].set(params["b2"].astype(jnp.float32))
    b = b.at[2, :widths[2]].set(params["b3"].astype(jnp.float32))
    b = b.at[3, :widths[3]].set(params["b4"].astype(jnp.float32))

    return {"w1": w1, "w2": w2, "w3": w3, "w4": w4, "b": b}


def mlp_forward(x, kp, *, block_batch=1024, elem_dtype=None, num_cores=None):
    """Run the fused MLP. kp = prepare_kernel_params(params)."""
    batch, in_features = x.shape
    out_features = kp["w4"].shape[1]

    if elem_dtype is None:
        elem_dtype = _default_elementwise_dtype()
    if num_cores is None:
        num_cores = _num_tensorcores()

    # Pad batch to a multiple of 8 (wrapper-side) instead of falling back to
    # one giant tile that could blow the scoped/physical VMEM limit.
    x = x.astype(jnp.float32)
    padded = _round_up(max(batch, 8), 8)
    if padded != batch:
        x = jnp.pad(x, ((0, padded - batch), (0, 0)))

    # Tile: big enough to amortize per-grid-step overhead, but split so a
    # 2-TC chip (v7x) gets >= 2 "parallel" grid steps when the batch allows.
    tb = min(block_batch, _round_up(pl.cdiv(padded, max(num_cores, 1)), 8))
    grid = (pl.cdiv(padded, tb),)

    kernel = functools.partial(mlp_kernel, elem_dtype=elem_dtype)

    def resident(shape):
        # Same block every grid step -> operand stays in VMEM, no re-DMA.
        return pl.BlockSpec(shape, lambda i: (0, 0))

    out = pl.pallas_call(
        kernel,
        out_shape=jax.ShapeDtypeStruct((padded, out_features), jnp.float32),
        grid=grid,
        in_specs=[
            pl.BlockSpec((tb, in_features), lambda i: (i, 0)),
            resident(kp["w1"].shape),
            resident(kp["w2"].shape),
            resident(kp["w3"].shape),
            resident(kp["w4"].shape),
            resident(kp["b"].shape),
        ],
        # True out_features-wide output (last dim equals full array dim -> legal).
        out_specs=pl.BlockSpec((tb, out_features), lambda i: (i, 0)),
        compiler_params=pltpu.CompilerParams(
            dimension_semantics=("parallel",)),
    )(x, kp["w1"], kp["w2"], kp["w3"], kp["w4"], kp["b"])

    return out[:batch] if padded != batch else out


def mlp_reference_f32(x, params):
    """Pure-f32 reference matching the PyTorch module."""
    h = x
    for i in range(1, 4):
        h = jnp.maximum(h @ params[f"w{i}"] + params[f"b{i}"], 0.0)
    return h @ params["w4"] + params["b4"]


def mlp_reference_kernel_numerics(x, params, elem_dtype):
    """Reference that mimics the kernel's numerics (bf16 operands, elem_dtype elementwise)."""
    cdt = jnp.bfloat16
    h = x.astype(cdt)
    for i in range(1, 4):
        w = params[f"w{i}"].astype(cdt)
        b = params[f"b{i}"].astype(elem_dtype)
        h = jnp.dot(h, w, preferred_element_type=elem_dtype)
        h = jnp.maximum(h + b, 0.0).astype(cdt)
    h = jnp.dot(h, params["w4"].astype(cdt), preferred_element_type=jnp.float32)
    return h + params["b4"].astype(jnp.float32)


if __name__ == "__main__":
    # Shapes implied by the module: in_features=16, hidden_features=32
    #   -> layers 16 -> 256 -> 128 -> 64 -> 4
    batch = 8
    in_features = 16
    hidden_features = 32
    out_features = 4

    key = jax.random.PRNGKey(0)
    k_x, k_p = jax.random.split(key)
    x = jax.random.normal(k_x, (batch, in_features), dtype=jnp.float32)
    params = init_params(k_p, in_features, hidden_features, out_features)
    kparams = prepare_kernel_params(params)

    elem_dtype = _default_elementwise_dtype()
    out = jax.block_until_ready(mlp_forward(x, kparams, elem_dtype=elem_dtype))

    assert out.shape == (batch, out_features)

    ref_kernel = mlp_reference_kernel_numerics(x, params, elem_dtype)
    ref_f32 = mlp_reference_f32(x, params)
    assert jnp.allclose(out, ref_kernel, atol=2e-2, rtol=2e-2), "mismatch vs kernel-numerics reference"
    assert jnp.allclose(out, ref_f32, atol=5e-2, rtol=5e-2), "mismatch vs f32 reference"

    print("KERNEL_OK")
</pallas_src>

<mosaic_0001>
module attributes {stable_mosaic.version = 11 : i64} {
  func.func @mlp_kernel(%arg0: i32, %arg1: memref<8x16xf32, #tpu.memory_space<vmem>>, %arg2: memref<16x256xbf16, #tpu.memory_space<vmem>>, %arg3: memref<256x128xbf16, #tpu.memory_space<vmem>>, %arg4: memref<128x64xbf16, #tpu.memory_space<vmem>>, %arg5: memref<64x4xbf16, #tpu.memory_space<vmem>>, %arg6: memref<4x256xf32, #tpu.memory_space<vmem>>, %arg7: memref<8x4xf32, #tpu.memory_space<vmem>>) attributes {dimension_semantics = [#tpu.dimension_semantics<parallel>], iteration_bounds = array<i64: 1>, scalar_prefetch = 0 : i64, scratch_operands = 0 : i64, tpu.core_type = #tpu.core_type<tc>, window_params = [{transform_indices = @transform_0, window_bounds = array<i64: 8, 16>}, {pipeline_mode = #tpu.pipeline_mode<synchronous>, transform_indices = @transform_1, window_bounds = array<i64: 16, 256>}, {pipeline_mode = #tpu.pipeline_mode<synchronous>, transform_indices = @transform_2, window_bounds = array<i64: 256, 128>}, {pipeline_mode = #tpu.pipeline_mode<synchronous>, transform_indices = @transform_3, window_bounds = array<i64: 128, 64>}, {pipeline_mode = #tpu.pipeline_mode<synchronous>, transform_indices = @transform_4, window_bounds = array<i64: 64, 4>}, {pipeline_mode = #tpu.pipeline_mode<synchronous>, transform_indices = @transform_5, window_bounds = array<i64: 4, 256>}, {transform_indices = @transform_6, window_bounds = array<i64: 8, 4>}]} {
    %c0 = arith.constant 0 : index
    %c0_0 = arith.constant 0 : index
    %0 = vector.load %arg1[%c0, %c0_0] : memref<8x16xf32, #tpu.memory_space<vmem>>, vector<8x16xf32>
    %1 = arith.truncf %0 : vector<8x16xf32> to vector<8x16xbf16>
    %c0_1 = arith.constant 0 : index
    %c0_2 = arith.constant 0 : index
    %2 = vector.load %arg2[%c0_1, %c0_2] : memref<16x256xbf16, #tpu.memory_space<vmem>>, vector<16x256xbf16>
    %cst = arith.constant dense<0.000000e+00> : vector<8x256xf32>
    %3 = tpu.matmul %1, %2, %cst {dimension_numbers = #tpu.dot_dimension_numbers<[1], [0], [0], [1], [0, 0, 1, 1], [], []>} : vector<8x16xbf16>, vector<16x256xbf16>, vector<8x256xf32> -> vector<8x256xf32>
    %c0_3 = arith.constant 0 : index
    %c0_4 = arith.constant 0 : index
    %4 = vector.load %arg6[%c0_3, %c0_4] : memref<4x256xf32, #tpu.memory_space<vmem>>, vector<1x256xf32>
    %5 = vector.broadcast %4 : vector<1x256xf32> to vector<8x256xf32>
    %6 = arith.addf %3, %5 : vector<8x256xf32>
    %cst_5 = arith.constant 0.000000e+00 : f32
    %7 = vector.broadcast %cst_5 : f32 to vector<8x256xf32>
    %8 = arith.maximumf %6, %7 : vector<8x256xf32>
    %9 = arith.truncf %8 : vector<8x256xf32> to vector<8x256xbf16>
    %c0_6 = arith.constant 0 : index
    %c0_7 = arith.constant 0 : index
    %10 = vector.load %arg3[%c0_6, %c0_7] : memref<256x128xbf16, #tpu.memory_space<vmem>>, vector<256x128xbf16>
    %cst_8 = arith.constant dense<0.000000e+00> : vector<8x128xf32>
    %11 = tpu.matmul %9, %10, %cst_8 {dimension_numbers = #tpu.dot_dimension_numbers<[1], [0], [0], [1], [0, 0, 1, 1], [], []>} : vector<8x256xbf16>, vector<256x128xbf16>, vector<8x128xf32> -> vector<8x128xf32>
    %c1 = arith.constant 1 : index
    %c0_9 = arith.constant 0 : index
    %12 = vector.load %arg6[%c1, %c0_9] : memref<4x256xf32, #tpu.memory_space<vmem>>, vector<1x128xf32>
    %13 = vector.broadcast %12 : vector<1x128xf32> to vector<8x128xf32>
    %14 = arith.addf %11, %13 : vector<8x128xf32>
    %cst_10 = arith.constant 0.000000e+00 : f32
    %15 = vector.broadcast %cst_10 : f32 to vector<8x128xf32>
    %16 = arith.maximumf %14, %15 : vector<8x128xf32>
    %17 = arith.truncf %16 : vector<8x128xf32> to vector<8x128xbf16>
    %c0_11 = arith.constant 0 : index
    %c0_12 = arith.constant 0 : index
    %18 = vector.load %arg4[%c0_11, %c0_12] : memref<128x64xbf16, #tpu.memory_space<vmem>>, vector<128x64xbf16>
    %cst_13 = arith.constant dense<0.000000e+00> : vector<8x64xf32>
    %19 = tpu.matmul %17, %18, %cst_13 {dimension_numbers = #tpu.dot_dimension_numbers<[1], [0], [0], [1], [0, 0, 1, 1], [], []>} : vector<8x128xbf16>, vector<128x64xbf16>, vector<8x64xf32> -> vector<8x64xf32>
    %c2 = arith.constant 2 : index
    %c0_14 = arith.constant 0 : index
    %20 = vector.load %arg6[%c2, %c0_14] : memref<4x256xf32, #tpu.memory_space<vmem>>, vector<1x64xf32>
    %21 = vector.broadcast %20 : vector<1x64xf32> to vector<8x64xf32>
    %22 = arith.addf %19, %21 : vector<8x64xf32>
    %cst_15 = arith.constant 0.000000e+00 : f32
    %23 = vector.broadcast %cst_15 : f32 to vector<8x64xf32>
    %24 = arith.maximumf %22, %23 : vector<8x64xf32>
    %25 = arith.truncf %24 : vector<8x64xf32> to vector<8x64xbf16>
    %c0_16 = arith.constant 0 : index
    %c0_17 = arith.constant 0 : index
    %26 = vector.load %arg5[%c0_16, %c0_17] : memref<64x4xbf16, #tpu.memory_space<vmem>>, vector<64x4xbf16>
    %cst_18 = arith.constant dense<0.000000e+00> : vector<8x4xf32>
    %27 = tpu.matmul %25, %26, %cst_18 {dimension_numbers = #tpu.dot_dimension_numbers<[1], [0], [0], [1], [0, 0, 1, 1], [], []>} : vector<8x64xbf16>, vector<64x4xbf16>, vector<8x4xf32> -> vector<8x4xf32>
    %c3 = arith.constant 3 : index
    %c0_19 = arith.constant 0 : index
    %28 = vector.load %arg6[%c3, %c0_19] : memref<4x256xf32, #tpu.memory_space<vmem>>, vector<1x4xf32>
    %29 = vector.broadcast %28 : vector<1x4xf32> to vector<8x4xf32>
    %30 = arith.addf %27, %29 : vector<8x4xf32>
    %c0_20 = arith.constant 0 : index
    %c0_21 = arith.constant 0 : index
    %31 = vector.load %arg7[%c0_20, %c0_21] : memref<8x4xf32, #tpu.memory_space<vmem>>, vector<8x4xf32>
    tpu.vector_store %arg7[%c0_20, %c0_21], %30 {strides = array<i32>} : memref<8x4xf32, #tpu.memory_space<vmem>>, vector<8x4xf32>,
    return
  }
  func.func @transform_0(%arg0: i32) -> (i32, i32) {
    %c0_i32 = arith.constant 0 : i32
    %c0_i32_0 = arith.constant 0 : i32
    return %arg0, %c0_i32 : i32, i32
  }
  func.func @transform_1(%arg0: i32) -> (i32, i32) {
    %c0_i32 = arith.constant 0 : i32
    %c0_i32_0 = arith.constant 0 : i32
    %c0_i32_1 = arith.constant 0 : i32
    return %c0_i32, %c0_i32_0 : i32, i32
  }
  func.func @transform_2(%arg0: i32) -> (i32, i32) {
    %c0_i32 = arith.constant 0 : i32
    %c0_i32_0 = arith.constant 0 : i32
    %c0_i32_1 = arith.constant 0 : i32
    return %c0_i32, %c0_i32_0 : i32, i32
  }
  func.func @transform_3(%arg0: i32) -> (i32, i32) {
    %c0_i32 = arith.constant 0 : i32
    %c0_i32_0 = arith.constant 0 : i32
    %c0_i32_1 = arith.constant 0 : i32
    return %c0_i32, %c0_i32_0 : i32, i32
  }
  func.func @transform_4(%arg0: i32) -> (i32, i32) {
    %c0_i32 = arith.constant 0 : i32
    %c0_i32_0 = arith.constant 0 : i32
    %c0_i32_1 = arith.constant 0 : i32
    return %c0_i32, %c0_i32_0 : i32, i32
  }
  func.func @transform_5(%arg0: i32) -> (i32, i32) {
    %c0_i32 = arith.constant 0 : i32
    %c0_i32_0 = arith.constant 0 : i32
    %c0_i32_1 = arith.constant 0 : i32
    return %c0_i32, %c0_i32_0 : i32, i32
  }
  func.func @transform_6(%arg0: i32) -> (i32, i32) {
    %c0_i32 = arith.constant 0 : i32
    %c0_i32_0 = arith.constant 0 : i32
    return %arg0, %c0_i32 : i32, i32
  }
}

</mosaic_0001>

<bundles_post_ra>
// kernel: tpu_custom_call.1
= control target key start
LH: loop header
LB: loop body
LE: loop exit
PB: predicated region body
PF: predicated region fallthrough
CT: control target
= control target key end

     0   :  { %11 = vsyncpa [#allocation3], 0  ;;  %s846_s0 = inlined_call_operand.hbm [shape: f32[8,16], index: 0, kind: input, shape index: {}]   ;;  %s847_s1 = inlined_call_operand.hbm [shape: bf16[16,256], index: 1, kind: input, shape index: {}]   ;;  %s848_s2 = inlined_call_operand.vmem [shape: bf16[256,128], index: 2, kind: input, shape index: {}]   ;;  %s849_s3 = inlined_call_operand.vmem [shape: bf16[128,64], index: 3, kind: input, shape index: {}]   ;;  %s850_s4 = inlined_call_operand.vmem [shape: bf16[64,4], index: 4, kind: input, shape index: {}]   ;;  %s851_s5 = inlined_call_operand.vmem [shape: f32[4,256], index: 5, kind: input, shape index: {}]   ;;  %s852_s6 = inlined_call_operand.vmem [shape: f32[8,4], index: 6, kind: output, shape index: {}]  }
   0x1   :  { %12 = vsyncpa [#allocation5], 0  ;;  %s685_s21 = smov [#allocation2]   ;;  %s686_s23 = smov [#allocation4]  }
   0x2   :  { %s19_s22 = sshll.u32 %s685_s21, 4  ;;  %s28_s24 = sshll.u32 %s686_s23, 4  ;;  %s20_s22 = int_to_ptr.vmem [resolvable:$true] %s19_s22  ;;  %s29_s24 = int_to_ptr.vmem [resolvable:$true] %s28_s24 }
   0x3   :  { %s649_s25 = scalar_lea.vmem %s20_s22, 128  ;;  %p654_p1 = scmp.lt.s32.totalorder %s20_s22, %s20_s22 }
   0x4   :  { %p650_p0 = scmp.ne.s32.totalorder %s20_s22, %s649_s25  ;;  %p655_p2 = scmp.lt.s32.totalorder %s649_s25, %s649_s25 }
   0x6   :  { %p656_p3 = por %p655_p2, %p654_p1 }
   0x8   :  { %p657_p4 = pnand %p656_p3, %p650_p0 }
   0xa   :  { %660 = shalt.err (!%p657_p4)
}
   0xb   :  { %22 = dma.hbm_to_vmem [thread:$0]  %s846_s0, 128, %s20_s22, [#allocation3]  }
   0xc   :  { %s669_s28 = scalar_lea.vmem %s29_s24, 256  ;;  %p674_p6 = scmp.lt.s32.totalorder %s29_s24, %s29_s24 }
   0xd   :  { %p670_p5 = scmp.ne.s32.totalorder %s29_s24, %s669_s28  ;;  %p675_p7 = scmp.lt.s32.totalorder %s669_s28, %s669_s28 }
   0xf   :  { %p676_p8 = por %p675_p7, %p674_p6 }
  0x11   :  { %p677_p9 = pnand %p676_p8, %p670_p5 }
  0x13   :  { %680 = shalt.err (!%p677_p9)
}
  0x14   :  { %s687_s29 = smov 128   ;;  %s688_s30 = smov 8  }
  0x15   :  { %34 = dma.hbm_to_vmem [thread:$0]  %s847_s1, 256, %s29_s24, [#allocation5], %s687_s29, %s687_s29, %s688_s30  }
  0x16   :  { %681 = dma.done.wait [#allocation3], 128  }
  0x17   :  { %682 = vsyncadd [#allocation3], 4294967168 }
  0x18   :  { %683 = dma.done.wait [#allocation5], 256  }
  0x19   :  { %684 = vsyncadd [#allocation5], 4294967040  ;;  %v689_v0 = vmov 0   ;;  %v610_v1 = vld [vmem:[#allocation4 + $0x4] ss:$8 sps:$4 sm:$0xff]   ;;  %v50_v3 = vld [vmem:[#allocation2] sm:$0xff]  ;;  %v56_v27 = vlaneseq }
  0x1a   :  { %112 = vmatprep.mubr.bf16.mxu0 %v689_v0  ;;  %v612_v2 = vld [vmem:[#allocation4] ss:$8 sps:$4 sm:$0xff]   ;;  %94 = vmatprep.subr.bf16.mxu0 %v610_v1  ;;  %v51_v4 = vpack.c.bf16 %v50_v3, %v50_v3  ;;  %v613_v5 = vld [vmem:[%s848_s2 + $0x78] sm:$0xff]   ;;  %vm76_vm0 = vcmask 130048   ;;  %v619_v11 = vld [vmem:[%s848_s2 + $0x60] sm:$0xff]   ;;  %v690_v22 = vmov 0.0  }
  0x1b   :  { %95 = vmatpush1.bf16.msra.mxu0 %v612_v2  ;;  %v614_v6 = vld [vmem:[%s848_s2 + $0x38] sm:$0xff]   ;;  %535 = vmatprep.subr.bf16.mxu1 %v613_v5  ;;  %v615_v7 = vld [vmem:[%s848_s2 + $0x70] sm:$0xff]   ;;  %v617_v9 = vld [vmem:[%s848_s2 + $0x68] sm:$0xff]   ;;  %v57_v28 = vshrl.u32 %v56_v27, 7  ;;  %vm691_vm1 = vmmov 0   ;;  %vm448_vm2 = vcmask 523264  }
  0x1c   :  { %536 = vmatpush3.bf16.msra.mxu1 %v614_v6  ;;  %v616_v8 = vld [vmem:[%s848_s2 + $0x30] sm:$0xff]   ;;  %v618_v10 = vld [vmem:[%s848_s2 + $0x28] sm:$0xff]   ;;  %v620_v12 = vld [vmem:[%s848_s2 + $0x20] sm:$0xff]   ;;  %571 = vmatprep.subr.bf16.mxu0 %v690_v22  ;;  %vm492_vm3 = vcmask 31744  }
  0x1d   :  { %537 = vmatprep.subr.bf16.mxu1 %v615_v7  ;;  %v621_v13 = vld [vmem:[%s848_s2 + $0x58] sm:$0xff]   ;;  %v623_v15 = vld [vmem:[%s848_s2 + $0x50] sm:$0xff]   ;;  %v625_v17 = vld [vmem:[%s848_s2 + $0x48] sm:$0xff]   ;;  %v58_v29 = vsub.s32 0, %v57_v28  ;;  %v62_v31 = vsub.s32 1, %v57_v28 }
  0x1e   :  { %502 = vmatmul.mubr.msk.bf16.vlgmr.msra.gmra.mxu0 %vm76_vm0, %v51_v4  ;;  %v622_v14 = vld [vmem:[%s848_s2 + $0x18] sm:$0xff]   ;;  %v624_v16 = vld [vmem:[%s848_s2 + $0x10] sm:$0xff]   ;;  %v626_v18 = vld [vmem:[%s848_s2 + $0x8] sm:$0xff]  }
  0x1f   :  { %v627_v19 = vld [vmem:[%s848_s2 + $0x40] sm:$0xff]   ;;  %v629_v21 = vld [vmem:[%s849_s3 + $0x38] sm:$0xff]   ;;  %v630_v23 = vld [vmem:[%s849_s3 + $0x30] sm:$0xff]   ;;  %587 = vmatprep.mubr.msk.bf16.mxu0 %vm691_vm1, %v690_v22 }
  0x20   :  { %538 = vmatpush3.bf16.msra.mxu1 %v616_v8  ;;  %v628_v20 = vld [vmem:[%s848_s2] sm:$0xff]   ;;  %572 = vmatpush3.bf16.msra.mxu0 %v629_v21  ;;  %v631_v24 = vld [vmem:[%s849_s3 + $0x28] sm:$0xff]   ;;  %v633_v26 = vld [vmem:[%s849_s3 + $0x18] sm:$0xff]  }
  0x21   :  { %539 = vmatprep.subr.bf16.mxu1 %v617_v9  ;;  %573 = vmatprep.subr.bf16.mxu0 %v690_v22  ;;  %v632_v25 = vld [vmem:[%s849_s3 + $0x20] sm:$0xff]   ;;  %v634_v44 = vld [vmem:[%s849_s3 + $0x10] sm:$0xff]   ;;  %v635_v45 = vld [vmem:[%s849_s3 + $0x8] sm:$0xff]  }
  0x22   :  { %v54_v30 = vld [vmem:[%s851_s5] ss:$4 sm:$0x3]  ;;  %v637_v47 = vld [vmem:[%s850_s4 + $0x18] sm:$0xff]   ;;  %v638_v48 = vld [vmem:[%s850_s4 + $0x10] sm:$0xff]  }
  0x23   :  { %v59_v32 = vrot.slane %v54_v30, %v58_v29  ;;  %v63_v33 = vrot.slane %v54_v30, %v62_v31  ;;  %v636_v46 = vld [vmem:[%s849_s3] sm:$0xff]   ;;  %v639_v58 = vld [vmem:[%s850_s4 + $0x8] sm:$0xff]  }
  0x24   :  { %540 = vmatpush3.bf16.msra.mxu1 %v618_v10  ;;  %574 = vmatpush3.bf16.msra.mxu0 %v630_v23  ;;  %v503_v50 = vld [vmem:[%s851_s5 + $0x1] ss:$0 sm:$0xff]  ;;  %v520_v60 = vld [vmem:[%s851_s5 + $0x2] ss:$0 sm:$0xff]  ;;  %v529_v4 = vld [vmem:[%s851_s5 + $0x3] ss:$0 sm:$0xff] }
  0x25   :  { %541 = vmatprep.subr.bf16.mxu1 %v619_v11  ;;  %575 = vmatprep.subr.bf16.mxu0 %v690_v22  ;;  %v640_v59 = vld [vmem:[%s850_s4] sm:$0xff]  }
  0x28   :  { %542 = vmatpush3.bf16.msra.mxu1 %v620_v12  ;;  %576 = vmatpush3.bf16.msra.mxu0 %v631_v24 }
  0x29   :  { %543 = vmatprep.subr.bf16.mxu1 %v621_v13  ;;  %577 = vmatprep.subr.bf16.mxu0 %v690_v22 }
  0x2c   :  { %544 = vmatpush3.bf16.msra.mxu1 %v622_v14  ;;  %578 = vmatpush3.bf16.msra.mxu0 %v632_v25 }
  0x2d   :  { %545 = vmatprep.subr.bf16.mxu1 %v623_v15  ;;  %579 = vmatprep.subr.bf16.mxu0 %v690_v22 }
  0x30   :  { %546 = vmatpush3.bf16.msra.mxu1 %v624_v16  ;;  %580 = vmatpush3.bf16.msra.mxu0 %v633_v26 }
  0x31   :  { %547 = vmatprep.subr.bf16.mxu1 %v625_v17  ;;  %581 = vmatprep.subr.bf16.mxu0 %v690_v22 }
  0x34   :  { %548 = vmatpush3.bf16.msra.mxu1 %v626_v18  ;;  %582 = vmatpush3.bf16.msra.mxu0 %v634_v44 }
  0x35   :  { %549 = vmatprep.subr.bf16.mxu1 %v627_v19  ;;  %583 = vmatprep.subr.bf16.mxu0 %v690_v22 }
  0x38   :  { %550 = vmatpush3.bf16.msra.mxu1 %v628_v20  ;;  %584 = vmatpush3.bf16.msra.mxu0 %v635_v45 }
  0x39   :  { %591 = vmatprep.subr.bf16.mxu1 %v690_v22  ;;  %585 = vmatprep.subr.bf16.mxu0 %v690_v22 }
  0x3c   :  { %586 = vmatpush3.bf16.msra.mxu0 %v636_v46 }
  0xde   :  { %v114_v34 = vpop.f32.mrf.mxu0 }
  0xdf   :  { %v115_v35 = vadd.f32 %v114_v34, %v59_v32 }
  0xe0   :  { %v116_v36 = vpop.f32.mrf.mxu0 }
  0xe1   :  { %v117_v37 = vadd.f32 %v116_v36, %v63_v33  ;;  %v121_v38 = vmax.f32 %v115_v35, 0.0 }
  0xe2   :  { %v118_v39 = vpop.f32.mrf.mxu0 }
  0xe3   :  { %v122_v40 = vmax.f32 %v117_v37, 0.0  ;;  %v123_v43 = vpack.c.bf16 %v121_v38, %v121_v38 }
  0xe4   :  { %v119_v41 = vpop.f32.mrf.mxu0 }
  0xe5   :  { %v124_v42 = vpack.c.bf16 %v122_v40, %v122_v40 }
  0xe7   :  { %290 = vmatprep.mubr.bf16.mxu1 %v124_v42 }
  0xe8   :  { %291 = vmatmul.mubr.bf16.vlgmr.msra.gmra.mxu1 %v123_v43 }
  0xe9   :  { %599 = vmatprep.mubr.msk.bf16.mxu1 %vm691_vm1, %v690_v22  ;;  %592 = vmatpush3.bf16.msra.mxu1 %v637_v47 }
  0xea   :  { %593 = vmatprep.subr.bf16.mxu1 %v690_v22 }
  0xed   :  { %594 = vmatpush3.bf16.msra.mxu1 %v638_v48 }
  0xee   :  { %595 = vmatprep.subr.bf16.mxu1 %v690_v22 }
  0xf1   :  { %596 = vmatpush3.bf16.msra.mxu1 %v639_v58 }
  0xf2   :  { %597 = vmatprep.subr.bf16.mxu1 %v690_v22 }
  0xf5   :  { %598 = vmatpush3.bf16.msra.mxu1 %v640_v59 }
 0x1a8   :  { %v551_v49 = vpop.f32.mrf.mxu1 }
 0x1aa   :  { %v552_v51 = vpop.f32.mrf.mxu1 }
 0x1ab   :  { %v553_v52 = vadd.f32 %v552_v51, %v551_v49 }
 0x1ac   :  { %v554_v53 = vpop.f32.mrf.mxu1 }
 0x1ad   :  { %v293_v54 = vadd.f32 %v553_v52, %v503_v50 }
 0x1ae   :  { %v555_v55 = vpop.f32.mrf.mxu1 }
 0x1af   :  { %v298_v56 = vmax.f32 %v293_v54, 0.0 }
 0x1b1   :  { %v299_v57 = vpack.c.bf16 %v298_v56, %v298_v56 }
 0x1b3   :  { %588 = vmatmul.mubr.bf16.vlgmr.msra.gmra.mxu0 %v299_v57 }
 0x273   :  { %v403_v61 = vpop.f32.mrf.mxu0 }
 0x274   :  { %v404_v62 = vadd.f32 %v520_v60, %v403_v61 }
 0x275   :  { %v589_v63 = vpop.f32.mrf.mxu0 }
 0x276   :  { %v409_v0 = vmax.f32 %v404_v62, 0.0 }
 0x277   :  { %v406_v1 = vpop.f32.mrf.mxu0 }
 0x278   :  { %v410_v2 = vpack.c.bf16 %v409_v0, %v409_v0 }
 0x279   :  { %v590_v3 = vpop.f32.mrf.mxu0 }
 0x27a   :  { %600 = vmatmul.mubr.msk.bf16.vlgmr.msra.gmra.mxu1 %vm448_vm2, %v410_v2 }
 0x33a   :  { %v486_v5 = vpop.f32.mrf.mxu1 }
 0x33b   :  { %v487_v6 = vadd.f32 %v529_v4, %v486_v5 }
 0x33c   :  { %v601_v7 = vpop.f32.mrf.mxu1 }
 0x33d   :  { %493 = vst.msk [vmem:[%s852_s6] sm:$0xff] %vm492_vm3, %v487_v6 }
 0x33e   :  { %v489_v8 = vpop.f32.mrf.mxu1 }
 0x340   :  { %v602_v9 = vpop.f32.mrf.mxu1 }
 0x341   :  { %498 = vsyncpa [#allocation3], 1 }
 0x342   :  { %499 = vsyncpa [#allocation5], 1 }

</bundles_post_ra>
